<compile_context>
chip_gen: v7x
topology: tpu7x:2x2x1
jax: 0.10.0
libtpu: 0.0.40
codegen_flags: <defaults>
</compile_context>

<pallas_src>
import jax
import jax.numpy as jnp
from jax.experimental import pallas as pl
from jax.experimental.pallas import tpu as pltpu


def _round_up(n, m):
    return ((n + m - 1) // m) * m


def _make_kernel(H, W):
    def kernel(pt_ref, xc_ref, yc_ref, wc_ref, w2_ref, o_ref):
        # pt_ref: (k1p, bp)      conv1 im2col patches (channels-first) + constant-1 bias row
        # xc_ref/yc_ref: (1, bp) per-pixel x / y coordinates (shared halo masks)
        # wc_ref: (3*crp, k1p)   [conv1*s1 | residual 1x1 | bn2-bias broadcast] transposed
        # w2_ref: (crp, k2p)     conv2 weights * s2, transposed, dense K
        # o_ref : (1, crp, bp)   packed, unpadded output (channels x pixels)
        crp = o_ref.shape[1]
        bp = o_ref.shape[2]
        k2p = w2_ref.shape[1]

        # conv1(+BN1) + residual 1x1 conv + BN2 bias broadcast: one MXU matmul.
        t = jnp.dot(wc_ref[...], pt_ref[...], preferred_element_type=jnp.float32)
        h1 = jnp.maximum(t[0:crp, :], 0.0)           # relu(bn1(conv1(x)))   (crp, bp)
        res = t[crp:2 * crp, :]                      # conv1x1(x) + bias     (crp, bp)
        bias2 = t[2 * crp:3 * crp, :]                # bn2 shift, pre-broadcast

        # conv2 im2col, channels-first: 9 lane-rolled, border-masked taps of h1,
        # sublane-aligned concat into a dense (k2p, bp) patch matrix.
        xr = xc_ref[...]
        yr = yc_ref[...]
        taps = []
        for dy in range(3):
            for dx in range(3):
                oy, ox = dy - 1, dx - 1
                s = oy * W + ox
                v = h1 if s == 0 else pltpu.roll(h1, shift=(-s) % bp, axis=1)
                cond = None
                if ox == -1:
                    cond = xr >= 1
                elif ox == 1:
                    cond = xr < W - 1
                if oy == -1:
                    c2 = yr >= 1
                    cond = c2 if cond is None else jnp.logical_and(cond, c2)
                elif oy == 1:
                    c2 = yr < H - 1
                    cond = c2 if cond is None else jnp.logical_and(cond, c2)
                if cond is not None:
                    v = jnp.where(cond, v, 0.0)
                taps.append(v)
        pad_rows = k2p - 9 * crp
        if pad_rows > 0:
            taps.append(jnp.zeros((pad_rows, bp), jnp.float32))
        p2 = jnp.concatenate(taps, axis=0)           # (k2p, bp)

        # conv2 -> BN2 -> ReLU, dropout (eval identity), residual add, final ReLU.
        h2 = jnp.maximum(
            jnp.dot(w2_ref[...], p2, preferred_element_type=jnp.float32) + bias2, 0.0)
        o_ref[0] = jnp.maximum(res + h2, 0.0)        # lane-dense, unpadded store

    return kernel


def conv_block_forward(x_nchw, p, eps=1e-5):
    """Fused Pallas forward of conv_block. x_nchw: (N, Cin, H, W) f32 -> (N, Cout, H, W)."""
    x = x_nchw.astype(jnp.float32)
    N, Cin, H, W = x.shape
    Cout = p["w1"].shape[-1]
    HW = H * W
    crp = _round_up(Cout, 8)                  # sublane-aligned channel count
    k1p = _round_up(9 * Cin + 1, 128)         # conv1 contraction depth (dense + bias row)
    k2p = _round_up(9 * crp, 128)             # conv2 contraction depth (dense)

    # ---- fold BN (eval-mode) + conv biases into per-channel scale/shift ----
    s1 = p["gamma1"] / jnp.sqrt(p["var1"] + eps)
    bb1 = (p["b1"] - p["mean1"]) * s1 + p["beta1"]
    s2 = p["gamma2"] / jnp.sqrt(p["var2"] + eps)
    bb2 = (p["b2"] - p["mean2"]) * s2 + p["beta2"]

    # ---- dense-K, transposed (channels-first) weight packing ----
    bias_row = 9 * Cin
    wc = jnp.zeros((3 * crp, k1p), jnp.float32)
    wc = wc.at[0:Cout, 0:9 * Cin].set((p["w1"].reshape(9 * Cin, Cout) * s1).T)
    wc = wc.at[0:Cout, bias_row].set(bb1)
    wc = wc.at[crp:crp + Cout, 4 * Cin:5 * Cin].set(p["wr"].T)    # 1x1 conv = center tap
    wc = wc.at[crp:crp + Cout, bias_row].set(p["br"])
    wc = wc.at[2 * crp:2 * crp + Cout, bias_row].set(bb2)

    w2s = jnp.pad(p["w2"] * s2[None, None, None, :],
                  ((0, 0), (0, 0), (0, crp - Cout), (0, 0)))      # pad in-channels to crp
    w2t = jnp.pad(w2s.reshape(9 * crp, Cout).T,
                  ((0, crp - Cout), (0, k2p - 9 * crp)))          # (crp, k2p)

    # ---- conv1 im2col patches, channels-first, built once in the wrapper ----
    xp = jnp.pad(x, ((0, 0), (0, 0), (1, 1), (1, 1)))
    taps = [xp[:, :, dy:dy + H, dx:dx + W] for dy in range(3) for dx in range(3)]
    pt = jnp.concatenate(taps, axis=1).reshape(N, 9 * Cin, HW)
    pieces = [pt, jnp.ones((N, 1, HW), jnp.float32)]
    if k1p - 9 * Cin - 1 > 0:
        pieces.append(jnp.zeros((N, k1p - 9 * Cin - 1, HW), jnp.float32))
    pt = jnp.concatenate(pieces, axis=1)                          # (N, k1p, HW)
    pt = jnp.transpose(pt, (1, 0, 2)).reshape(k1p, N * HW)        # all pixels on lanes

    # per-pixel coordinates (shared conv2 halo masks, independent of image index)
    pix = jnp.arange(HW, dtype=jnp.int32)
    xcol = jnp.tile((pix % W)[None, :], (1, N))                   # (1, N*HW)
    ycol = jnp.tile((pix // W)[None, :], (1, N))

    # ---- images per grid step (lane-batched); keep grid >= 2 for v7x megacore ----
    if HW % 128 != 0:
        B = N                                    # full-array blocks are always legal
    elif N % 2 == 0 and N >= 4:
        B = max(1, min(N // 2, 8))
        while N % B:
            B -= 1
    else:
        B = 1
    G = N // B
    bp = B * HW

    out = pl.pallas_call(
        _make_kernel(H, W),
        out_shape=jax.ShapeDtypeStruct((G, crp, bp), jnp.float32),
        grid=(G,),
        in_specs=[
            pl.BlockSpec((k1p, bp), lambda i: (0, i)),
            pl.BlockSpec((1, bp), lambda i: (0, i)),
            pl.BlockSpec((1, bp), lambda i: (0, i)),
            pl.BlockSpec((3 * crp, k1p), lambda i: (0, 0)),
            pl.BlockSpec((crp, k2p), lambda i: (0, 0)),
        ],
        out_specs=pl.BlockSpec((1, crp, bp), lambda i: (i, 0, 0)),
        compiler_params=pltpu.CompilerParams(
            dimension_semantics=("parallel",),
            vmem_limit_bytes=32 * 1024 * 1024),
    )(pt, xcol, ycol, wc, w2t)

    # (G, crp, B*HW) -> (N, Cout, H, W): metadata reshapes + tiny real-sized rearrange.
    out = out.reshape(G, crp, B, HW).transpose(0, 2, 1, 3).reshape(N, crp, H, W)
    return out[:, :Cout]


def reference_forward(x_nchw, p, eps=1e-5):
    """Plain-JAX reference matching PyTorch eval-mode conv_block semantics."""
    x = jnp.transpose(x_nchw, (0, 2, 3, 1)).astype(jnp.float32)
    dn = ("NHWC", "HWIO", "NHWC")
    conv = lambda a, w: jax.lax.conv_general_dilated(
        a, w, (1, 1), "SAME", dimension_numbers=dn,
        precision=jax.lax.Precision.HIGHEST)
    residual = conv(x, p["wr"][None, None]) + p["br"]
    h = conv(x, p["w1"]) + p["b1"]
    h = (h - p["mean1"]) / jnp.sqrt(p["var1"] + eps) * p["gamma1"] + p["beta1"]
    h = jnp.maximum(h, 0.0)
    h = conv(h, p["w2"]) + p["b2"]
    h = (h - p["mean2"]) / jnp.sqrt(p["var2"] + eps) * p["gamma2"] + p["beta2"]
    h = jnp.maximum(h, 0.0)
    out = jnp.maximum(residual + h, 0.0)
    return jnp.transpose(out, (0, 3, 1, 2))


def init_params(key, ch_in, ch_out):
    ks = jax.random.split(key, 10)
    f = jnp.float32
    return {
        "w1": 0.2 * jax.random.normal(ks[0], (3, 3, ch_in, ch_out), f),
        "b1": 0.1 * jax.random.normal(ks[1], (ch_out,), f),
        "w2": 0.2 * jax.random.normal(ks[2], (3, 3, ch_out, ch_out), f),
        "b2": 0.1 * jax.random.normal(ks[3], (ch_out,), f),
        "wr": 0.2 * jax.random.normal(ks[4], (ch_in, ch_out), f),
        "br": 0.1 * jax.random.normal(ks[5], (ch_out,), f),
        # BatchNorm (eval-mode) parameters / running stats
        "gamma1": 1.0 + 0.1 * jax.random.normal(ks[6], (ch_out,), f),
        "beta1": 0.1 * jax.random.normal(ks[7], (ch_out,), f),
        "mean1": 0.05 * jax.random.normal(ks[8], (ch_out,), f),
        "var1": jnp.ones((ch_out,), f) * 1.3,
        "gamma2": 1.0 + 0.1 * jax.random.normal(ks[9], (ch_out,), f),
        "beta2": jnp.full((ch_out,), 0.02, f),
        "mean2": jnp.full((ch_out,), -0.03, f),
        "var2": jnp.ones((ch_out,), f) * 0.9,
    }


if __name__ == "__main__":
    N, CH_IN, CH_OUT, H, W = 2, 4, 8, 16, 16
    key = jax.random.PRNGKey(0)
    kx, kp = jax.random.split(key)
    x = jax.random.normal(kx, (N, CH_IN, H, W), jnp.float32)
    params = init_params(kp, CH_IN, CH_OUT)

    out = jax.block_until_ready(conv_block_forward(x, params))
    ref = jax.block_until_ready(reference_forward(x, params))

    assert out.shape == (N, CH_OUT, H, W)
    assert jnp.allclose(out, ref, atol=1e-4, rtol=1e-4), (
        f"max abs err {jnp.max(jnp.abs(out - ref))}")
    print("KERNEL_OK")
</pallas_src>

<mosaic_0001>
module attributes {stable_mosaic.version = 11 : i64} {
  func.func @kernel(%arg0: i32, %arg1: memref<128x256xf32, #tpu.memory_space<vmem>>, %arg2: memref<1x256xi32, #tpu.memory_space<vmem>>, %arg3: memref<1x256xi32, #tpu.memory_space<vmem>>, %arg4: memref<24x128xf32, #tpu.memory_space<vmem>>, %arg5: memref<8x128xf32, #tpu.memory_space<vmem>>, %arg6: memref<1x8x256xf32, #tpu.memory_space<vmem>>) attributes {dimension_semantics = [#tpu.dimension_semantics<parallel>], iteration_bounds = array<i64: 2>, scalar_prefetch = 0 : i64, scratch_operands = 0 : i64, tpu.core_type = #tpu.core_type<tc>, window_params = [{transform_indices = @transform_0, window_bounds = array<i64: 128, 256>}, {transform_indices = @transform_1, window_bounds = array<i64: 1, 256>}, {transform_indices = @transform_2, window_bounds = array<i64: 1, 256>}, {pipeline_mode = #tpu.pipeline_mode<synchronous>, transform_indices = @transform_3, window_bounds = array<i64: 24, 128>}, {pipeline_mode = #tpu.pipeline_mode<synchronous>, transform_indices = @transform_4, window_bounds = array<i64: 8, 128>}, {transform_indices = @transform_5, window_bounds = array<i64: 1, 8, 256>}]} {
    %c0 = arith.constant 0 : index
    %c0_0 = arith.constant 0 : index
    %0 = vector.load %arg4[%c0, %c0_0] : memref<24x128xf32, #tpu.memory_space<vmem>>, vector<24x128xf32>
    %c0_1 = arith.constant 0 : index
    %c0_2 = arith.constant 0 : index
    %1 = vector.load %arg1[%c0_1, %c0_2] : memref<128x256xf32, #tpu.memory_space<vmem>>, vector<128x256xf32>
    %cst = arith.constant dense<0.000000e+00> : vector<24x256xf32>
    %2 = tpu.matmul %0, %1, %cst {dimension_numbers = #tpu.dot_dimension_numbers<[1], [0], [0], [1], [0, 0, 1, 1], [], []>} : vector<24x128xf32>, vector<128x256xf32>, vector<24x256xf32> -> vector<24x256xf32>
    %3 = vector.extract_strided_slice %2 {offsets = [0, 0], sizes = [8, 256], strides = [1, 1]} : vector<24x256xf32> to vector<8x256xf32>
    %cst_3 = arith.constant 0.000000e+00 : f32
    %4 = vector.broadcast %cst_3 : f32 to vector<8x256xf32>
    %5 = arith.maximumf %3, %4 : vector<8x256xf32>
    %6 = vector.extract_strided_slice %2 {offsets = [8, 0], sizes = [8, 256], strides = [1, 1]} : vector<24x256xf32> to vector<8x256xf32>
    %7 = vector.extract_strided_slice %2 {offsets = [16, 0], sizes = [8, 256], strides = [1, 1]} : vector<24x256xf32> to vector<8x256xf32>
    %c0_4 = arith.constant 0 : index
    %c0_5 = arith.constant 0 : index
    %8 = vector.load %arg2[%c0_4, %c0_5] : memref<1x256xi32, #tpu.memory_space<vmem>>, vector<1x256xi32>
    %c0_6 = arith.constant 0 : index
    %c0_7 = arith.constant 0 : index
    %9 = vector.load %arg3[%c0_6, %c0_7] : memref<1x256xi32, #tpu.memory_space<vmem>>, vector<1x256xi32>
    %c17_i32 = arith.constant 17 : i32
    %10 = tpu.dynamic_rotate %5 by %c17_i32 dim 1 : vector<8x256xf32>, i32 -> vector<8x256xf32>
    %c1_i32 = arith.constant 1 : i32
    %11 = vector.broadcast %c1_i32 : i32 to vector<1x256xi32>
    %12 = arith.cmpi sge, %8, %11 : vector<1x256xi32>
    %c1_i32_8 = arith.constant 1 : i32
    %13 = vector.broadcast %c1_i32_8 : i32 to vector<1x256xi32>
    %14 = arith.cmpi sge, %9, %13 : vector<1x256xi32>
    %15 = arith.andi %12, %14 : vector<1x256xi1>
    %cst_9 = arith.constant 0.000000e+00 : f32
    %16 = vector.shape_cast %15 : vector<1x256xi1> to vector<1x256xi1>
    %17 = vector.broadcast %16 : vector<1x256xi1> to vector<8x256xi1>
    %18 = vector.broadcast %cst_9 : f32 to vector<8x256xf32>
    %19 = arith.select %17, %10, %18 : vector<8x256xi1>, vector<8x256xf32>
    %c16_i32 = arith.constant 16 : i32
    %20 = tpu.dynamic_rotate %5 by %c16_i32 dim 1 : vector<8x256xf32>, i32 -> vector<8x256xf32>
    %c1_i32_10 = arith.constant 1 : i32
    %21 = vector.broadcast %c1_i32_10 : i32 to vector<1x256xi32>
    %22 = arith.cmpi sge, %9, %21 : vector<1x256xi32>
    %cst_11 = arith.constant 0.000000e+00 : f32
    %23 = vector.shape_cast %22 : vector<1x256xi1> to vector<1x256xi1>
    %24 = vector.broadcast %23 : vector<1x256xi1> to vector<8x256xi1>
    %25 = vector.broadcast %cst_11 : f32 to vector<8x256xf32>
    %26 = arith.select %24, %20, %25 : vector<8x256xi1>, vector<8x256xf32>
    %c15_i32 = arith.constant 15 : i32
    %27 = tpu.dynamic_rotate %5 by %c15_i32 dim 1 : vector<8x256xf32>, i32 -> vector<8x256xf32>
    %c15_i32_12 = arith.constant 15 : i32
    %28 = vector.broadcast %c15_i32_12 : i32 to vector<1x256xi32>
    %29 = arith.cmpi slt, %8, %28 : vector<1x256xi32>
    %c1_i32_13 = arith.constant 1 : i32
    %30 = vector.broadcast %c1_i32_13 : i32 to vector<1x256xi32>
    %31 = arith.cmpi sge, %9, %30 : vector<1x256xi32>
    %32 = arith.andi %29, %31 : vector<1x256xi1>
    %cst_14 = arith.constant 0.000000e+00 : f32
    %33 = vector.shape_cast %32 : vector<1x256xi1> to vector<1x256xi1>
    %34 = vector.broadcast %33 : vector<1x256xi1> to vector<8x256xi1>
    %35 = vector.broadcast %cst_14 : f32 to vector<8x256xf32>
    %36 = arith.select %34, %27, %35 : vector<8x256xi1>, vector<8x256xf32>
    %c1_i32_15 = arith.constant 1 : i32
    %37 = tpu.dynamic_rotate %5 by %c1_i32_15 dim 1 : vector<8x256xf32>, i32 -> vector<8x256xf32>
    %c1_i32_16 = arith.constant 1 : i32
    %38 = vector.broadcast %c1_i32_16 : i32 to vector<1x256xi32>
    %39 = arith.cmpi sge, %8, %38 : vector<1x256xi32>
    %cst_17 = arith.constant 0.000000e+00 : f32
    %40 = vector.shape_cast %39 : vector<1x256xi1> to vector<1x256xi1>
    %41 = vector.broadcast %40 : vector<1x256xi1> to vector<8x256xi1>
    %42 = vector.broadcast %cst_17 : f32 to vector<8x256xf32>
    %43 = arith.select %41, %37, %42 : vector<8x256xi1>, vector<8x256xf32>
    %c255_i32 = arith.constant 255 : i32
    %44 = tpu.dynamic_rotate %5 by %c255_i32 dim 1 : vector<8x256xf32>, i32 -> vector<8x256xf32>
    %c15_i32_18 = arith.constant 15 : i32
    %45 = vector.broadcast %c15_i32_18 : i32 to vector<1x256xi32>
    %46 = arith.cmpi slt, %8, %45 : vector<1x256xi32>
    %cst_19 = arith.constant 0.000000e+00 : f32
    %47 = vector.shape_cast %46 : vector<1x256xi1> to vector<1x256xi1>
    %48 = vector.broadcast %47 : vector<1x256xi1> to vector<8x256xi1>
    %49 = vector.broadcast %cst_19 : f32 to vector<8x256xf32>
    %50 = arith.select %48, %44, %49 : vector<8x256xi1>, vector<8x256xf32>
    %c241_i32 = arith.constant 241 : i32
    %51 = tpu.dynamic_rotate %5 by %c241_i32 dim 1 : vector<8x256xf32>, i32 -> vector<8x256xf32>
    %c1_i32_20 = arith.constant 1 : i32
    %52 = vector.broadcast %c1_i32_20 : i32 to vector<1x256xi32>
    %53 = arith.cmpi sge, %8, %52 : vector<1x256xi32>
    %c15_i32_21 = arith.constant 15 : i32
    %54 = vector.broadcast %c15_i32_21 : i32 to vector<1x256xi32>
    %55 = arith.cmpi slt, %9, %54 : vector<1x256xi32>
    %56 = arith.andi %53, %55 : vector<1x256xi1>
    %cst_22 = arith.constant 0.000000e+00 : f32
    %57 = vector.shape_cast %56 : vector<1x256xi1> to vector<1x256xi1>
    %58 = vector.broadcast %57 : vector<1x256xi1> to vector<8x256xi1>
    %59 = vector.broadcast %cst_22 : f32 to vector<8x256xf32>
    %60 = arith.select %58, %51, %59 : vector<8x256xi1>, vector<8x256xf32>
    %c240_i32 = arith.constant 240 : i32
    %61 = tpu.dynamic_rotate %5 by %c240_i32 dim 1 : vector<8x256xf32>, i32 -> vector<8x256xf32>
    %c15_i32_23 = arith.constant 15 : i32
    %62 = vector.broadcast %c15_i32_23 : i32 to vector<1x256xi32>
    %63 = arith.cmpi slt, %9, %62 : vector<1x256xi32>
    %cst_24 = arith.constant 0.000000e+00 : f32
    %64 = vector.shape_cast %63 : vector<1x256xi1> to vector<1x256xi1>
    %65 = vector.broadcast %64 : vector<1x256xi1> to vector<8x256xi1>
    %66 = vector.broadcast %cst_24 : f32 to vector<8x256xf32>
    %67 = arith.select %65, %61, %66 : vector<8x256xi1>, vector<8x256xf32>
    %c239_i32 = arith.constant 239 : i32
    %68 = tpu.dynamic_rotate %5 by %c239_i32 dim 1 : vector<8x256xf32>, i32 -> vector<8x256xf32>
    %c15_i32_25 = arith.constant 15 : i32
    %69 = vector.broadcast %c15_i32_25 : i32 to vector<1x256xi32>
    %70 = arith.cmpi slt, %8, %69 : vector<1x256xi32>
    %c15_i32_26 = arith.constant 15 : i32
    %71 = vector.broadcast %c15_i32_26 : i32 to vector<1x256xi32>
    %72 = arith.cmpi slt, %9, %71 : vector<1x256xi32>
    %73 = arith.andi %70, %72 : vector<1x256xi1>
    %cst_27 = arith.constant 0.000000e+00 : f32
    %74 = vector.shape_cast %73 : vector<1x256xi1> to vector<1x256xi1>
    %75 = vector.broadcast %74 : vector<1x256xi1> to vector<8x256xi1>
    %76 = vector.broadcast %cst_27 : f32 to vector<8x256xf32>
    %77 = arith.select %75, %68, %76 : vector<8x256xi1>, vector<8x256xf32>
    %cst_28 = arith.constant 0.000000e+00 : f32
    %78 = vector.broadcast %cst_28 : f32 to vector<56x256xf32>
    %79 = tpu.concatenate %19, %26, %36, %43, %5, %50, %60, %67, %77, %78 in 0 : vector<8x256xf32>, vector<8x256xf32>, vector<8x256xf32>, vector<8x256xf32>, vector<8x256xf32>, vector<8x256xf32>, vector<8x256xf32>, vector<8x256xf32>, vector<8x256xf32>, vector<56x256xf32> -> vector<128x256xf32>
    %c0_29 = arith.constant 0 : index
    %c0_30 = arith.constant 0 : index
    %80 = vector.load %arg5[%c0_29, %c0_30] : memref<8x128xf32, #tpu.memory_space<vmem>>, vector<8x128xf32>
    %cst_31 = arith.constant dense<0.000000e+00> : vector<8x256xf32>
    %81 = tpu.matmul %80, %79, %cst_31 {dimension_numbers = #tpu.dot_dimension_numbers<[1], [0], [0], [1], [0, 0, 1, 1], [], []>} : vector<8x128xf32>, vector<128x256xf32>, vector<8x256xf32> -> vector<8x256xf32>
    %82 = arith.addf %81, %7 : vector<8x256xf32>
    %cst_32 = arith.constant 0.000000e+00 : f32
    %83 = vector.broadcast %cst_32 : f32 to vector<8x256xf32>
    %84 = arith.maximumf %82, %83 : vector<8x256xf32>
    %85 = arith.addf %6, %84 : vector<8x256xf32>
    %cst_33 = arith.constant 0.000000e+00 : f32
    %86 = vector.broadcast %cst_33 : f32 to vector<8x256xf32>
    %87 = arith.maximumf %85, %86 : vector<8x256xf32>
    %c0_34 = arith.constant 0 : index
    %c0_35 = arith.constant 0 : index
    %c0_36 = arith.constant 0 : index
    %88 = vector.load %arg6[%c0_34, %c0_35, %c0_36] : memref<1x8x256xf32, #tpu.memory_space<vmem>>, vector<1x8x256xf32>
    %89 = vector.shape_cast %88 : vector<1x8x256xf32> to vector<8x256xf32>
    %90 = vector.shape_cast %87 : vector<8x256xf32> to vector<1x8x256xf32>
    tpu.vector_store %arg6[%c0_34, %c0_35, %c0_36], %90 {strides = array<i32>} : memref<1x8x256xf32, #tpu.memory_space<vmem>>, vector<1x8x256xf32>,
    return
  }
  func.func @transform_0(%arg0: i32) -> (i32, i32) {
    %c0_i32 = arith.constant 0 : i32
    %c0_i32_0 = arith.constant 0 : i32
    return %c0_i32, %arg0 : i32, i32
  }
  func.func @transform_1(%arg0: i32) -> (i32, i32) {
    %c0_i32 = arith.constant 0 : i32
    %c0_i32_0 = arith.constant 0 : i32
    return %c0_i32, %arg0 : i32, i32
  }
  func.func @transform_2(%arg0: i32) -> (i32, i32) {
    %c0_i32 = arith.constant 0 : i32
    %c0_i32_0 = arith.constant 0 : i32
    return %c0_i32, %arg0 : i32, i32
  }
  func.func @transform_3(%arg0: i32) -> (i32, i32) {
    %c0_i32 = arith.constant 0 : i32
    %c0_i32_0 = arith.constant 0 : i32
    %c0_i32_1 = arith.constant 0 : i32
    return %c0_i32, %c0_i32_0 : i32, i32
  }
  func.func @transform_4(%arg0: i32) -> (i32, i32) {
    %c0_i32 = arith.constant 0 : i32
    %c0_i32_0 = arith.constant 0 : i32
    %c0_i32_1 = arith.constant 0 : i32
    return %c0_i32, %c0_i32_0 : i32, i32
  }
  func.func @transform_5(%arg0: i32) -> (i32, i32, i32) {
    %c0_i32 = arith.constant 0 : i32
    %c0_i32_0 = arith.constant 0 : i32
    %c0_i32_1 = arith.constant 0 : i32
    return %arg0, %c0_i32, %c0_i32_0 : i32, i32, i32
  }
}

</mosaic_0001>

<bundles_post_ra>
// kernel: tpu_custom_call.1
= control target key start
LH: loop header
LB: loop body
LE: loop exit
PB: predicated region body
PF: predicated region fallthrough
CT: control target
= control target key end

     0   :  { %s1721_s0 = inlined_call_operand.hbm [shape: f32[128,512], index: 0, kind: input, shape index: {}]   ;;  %s1722_s1 = inlined_call_operand.hbm [shape: s32[1,512], index: 1, kind: input, shape index: {}]   ;;  %s1723_s2 = inlined_call_operand.vmem [shape: s32[1,512], index: 2, kind: input, shape index: {}]   ;;  %s1724_s3 = inlined_call_operand.hbm [shape: f32[24,128], index: 3, kind: input, shape index: {}]   ;;  %s1725_s4 = inlined_call_operand.vmem [shape: f32[8,128], index: 4, kind: input, shape index: {}]   ;;  %s1726_s5 = inlined_call_operand.hbm [shape: f32[2,8,256], index: 5, kind: output, shape index: {}]  }
   0x1   :  { %1733 = sst [smem:[#allocation15_spill]] %s1721_s0 }
   0x2   :  { %1734 = sst [smem:[#allocation16_spill]] %s1724_s3 }
   0x3   :  { %10 = vsyncpa [#allocation3], 0 }
   0x4   :  { %12 = vsyncpa [#allocation3 + $0x1], 0 }
   0x5   :  { %13 = vsyncpa [#allocation6], 0 }
   0x6   :  { %15 = vsyncpa [#allocation6 + $0x1], 0 }
   0x7   :  { %16 = vsyncpa [#allocation4], 0 }
   0x8   :  { %18 = vsyncpa [#allocation4 + $0x1], 0  ;;  %s1239_s18 = smov 0   ;;  %s1241_s19 = smov 0  }
   0x9   :  { %s1243_s20 = smov 0   ;;  %s1245_s21 = smov 0  }
   0xa LB: > { %1735 = sst [smem:[#allocation13_spill]] %s1183_s20  ;;  %s1260_s22 = sadd.s32 4294967295, %s1187_s21   ;;  %s1187_s21 = sphi %s1245_s21, %s1793_s21   ;;  %s1183_s20 = sphi %s1243_s20, %s1790_s20   ;;  %s1179_s19 = sphi %s1241_s19, %s1792_s19   ;;  %s1175_s18 = sphi %s1239_s18, %s1791_s18  }
   0xb   : > { %s814_s23 = sadd.s32 4294967294, %s1187_s21   ;;  %s1264_s24 = sadd.s32 1, %s1187_s21  }
   0xc   : > { %s31_s25 = sadd.s32 1, %s1183_s20  ;;  %s28_s26 = ssub.s32 %s1187_s21, %s1264_s24 }
   0xd   : > { %p38_p0 = scmp.ne.s32.totalorder %s1183_s20, %s1179_s19  ;;  %p29_p1 = scmp.eq.s32.totalorder %s28_s26, 0 }
   0xe   : > { %p39_p2 = scmp.eq.s32.totalorder %s1187_s21, 0  ;;  %p44_p3 = scmp.ne.s32.totalorder %s1179_s19, %s1175_s18 }
   0xf   : > { %p1727_p4 = scmp.eq.s32.totalorder %s1260_s22, 0  ;;  %p162_p7 = scmp.eq.s32.totalorder %s1260_s22, 1 }
  0x10   : > { %s1276_s27 = scalar_select %p29_p1, %s1183_s20, %s31_s25  }
  0x11   : > { %p1278_p5 = por %p39_p2, %p38_p0  ;;  %p1284_p6 = por %p1727_p4, %p44_p3 }
  0x12   : > { %1736 = sst [smem:[#allocation14_spill]] %s1276_s27  ;;  %p168_p8 = scmp.eq.s32.totalorder %s814_s23, 1 }
  0x13   : > { %s1737_s28 = scalar_select %p1278_p5, 1, 0 }
  0x14   : > { %s1738_s29 = scalar_select %p1284_p6, 1, 0 }
  0x15   : > { %p815_p9 = scmp.ge.s32.totalorder %s1187_s21, 1  ;;  %p175_p10 = scmp.lt.s32.totalorder %s1187_s21, 3 }
  0x16   : > { %p1291_p11 = por %p162_p7, %p38_p0  ;;  %p1295_p12 = por %p168_p8, %p44_p3 }
  0x17   : > { %p1299_p13 = pnand %p815_p9, %p175_p10  ;;  %s1189_s8 = smov [#allocation7]  }
  0x18   : > { %s1739_s30 = scalar_select %p1291_p11, 1, 0 }
  0x19   : > { %s1740_s6 = scalar_select %p1295_p12, 1, 0 }
  0x1a   : > { %s1741_s7 = scalar_select %p1299_p13, 1, 0 }
  0x1b   : > { %p922_p1 = pneg %p1299_p13  ;;  %s187_s9 = sshll.u32 %s1189_s8, 4  ;;  %s188_s9 = int_to_ptr.vmem [resolvable:$true] %s187_s9 }
  0x1c   : > { %s1314_s11 = sand.u32 1, %s1183_s20   ;;  %s1743_s3 = sld [smem:[#allocation16_spill]] }
  0x1d   : > { %p1307_p2 = pnand %p922_p1, %p1727_p4 }
  0x1f   : > { %p1027_p8 = pneg %p1307_p2 }
  0x22   : > { %s1025_s14 = scalar_lea.hbm %s1743_s3, 384 }
  0x23   : > { %p1026_p7 = scmp.ne.s32.totalorder %s1743_s3, %s1025_s14  ;;  %p1032_p1 = scmp.lt.u32.totalorder %s1025_s14, %s1743_s3 }
  0x25   : > { %p1028_p9 = pnand %p1027_p8, %p1026_p7 }
  0x27   : > { %p1029_p10 = pneg %p1028_p9 }
  0x29   : > { %p1034_p0 = pnand %p1032_p1, %p1029_p10 }
  0x2b   : > { %1037 = shalt.err (!%p1034_p0)
}
  0x2c   : > { %s1038_s25 = scalar_lea.vmem %s188_s9, 384  ;;  %p1046_p11 = scmp.lt.s32.totalorder %s188_s9, %s188_s9 }
  0x2d   : > { %p1039_p4 = scmp.ne.s32.totalorder %s188_s9, %s1038_s25  ;;  %p1047_p6 = scmp.lt.s32.totalorder %s1038_s25, %s1038_s25 }
  0x2f   : > { %p1041_p3 = pnand %p1039_p4, %p1027_p8  ;;  %p1048_p13 = por %p1047_p6, %p1046_p11 }
  0x31   : > { %p1042_p12 = pneg %p1041_p3 }
  0x33   : > { %p1049_p5 = pnand %p1048_p13, %p1042_p12 }
  0x35   : > { %1052 = shalt.err (!%p1049_p5)
}
  0x36   : > { %s1190_s26 = smov 128   ;;  %s1191_s8 = smov 8  }
  0x37   : > { %925 = dma.hbm_to_vmem [thread:$0]  (!%p1307_p2), %s1743_s3, 384, %s188_s9, [#allocation6], %s1190_s26, %s1190_s26, %s1191_s8  }
  0x38   : > { %p1744_p4 = scmp.ne.s32.totalorder %s1737_s28, 0  ;;  %p1745_p0 = scmp.lt.s32.totalorder %s1187_s21, 2 }
  0x39   : > { %s818_s15 = sshll.u32 %s1314_s11, 8  ;;  %s851_s16 = sshll.u32 %s1187_s21, 8 }
  0x3a   : > { %p1336_p3 = pnand %p1745_p0, %p1744_p4  ;;  %s1747_s0 = sld [smem:[#allocation15_spill]] }
  0x3b   : > { %s208_s9 = scalar_lea.vmem [#allocation2], %s818_s15  ;;  %s205_s26 = scalar_lea.sflag [#allocation3], %s1314_s11 }
  0x3c   : > { %s215_s28 = sshll.u32 %s208_s9, 4  ;;  %p1055_p6 = pneg %p1336_p3  ;;  %s1347_s28 = int_to_ptr.vmem [resolvable:$true] %s215_s28 }
  0x40   : > { %s1345_s25 = scalar_lea.hbm %s1747_s0, %s851_s16  ;;  %s1058_s16 = scalar_lea.hbm %s1747_s0, 8192 }
  0x41   : > { %s1053_s8 = scalar_lea.hbm %s1345_s25, 4096  ;;  %p1059_p13 = scmp.lt.u32.totalorder %s1345_s25, %s1747_s0 }
  0x42   : > { %p1054_p5 = scmp.ne.s32.totalorder %s1345_s25, %s1053_s8  ;;  %p1060_p2 = scmp.lt.u32.totalorder %s1058_s16, %s1053_s8 }
  0x43   : > { %p1062_p8 = scmp.lt.u32.totalorder %s1053_s8, %s1345_s25 }
  0x44   : > { %p1056_p11 = pnand %p1055_p6, %p1054_p5  ;;  %p1061_p7 = por %p1060_p2, %p1059_p13 }
  0x46   : > { %p1057_p12 = pneg %p1056_p11  ;;  %p1063_p9 = por %p1062_p8, %p1061_p7 }
  0x48   : > { %p1064_p10 = pnand %p1063_p9, %p1057_p12 }
  0x4a   : > { %1067 = shalt.err (!%p1064_p10)
}
  0x4b   : > { %s1068_s15 = scalar_lea.vmem %s1347_s28, 4096  ;;  %s1192_s9 = smov [#allocation2]  }
  0x4c   : > { %p1069_p1 = scmp.ne.s32.totalorder %s1347_s28, %s1068_s15  ;;  %s1073_s12 = sshll.u32 %s1192_s9, 4  ;;  %s1074_s12 = int_to_ptr.vmem [resolvable:$false] %s1073_s12 }
  0x4d   : > { %s1075_s13 = scalar_lea.vmem %s1074_s12, 8192  ;;  %p1076_p5 = scmp.lt.s32.totalorder %s1347_s28, %s1074_s12 }
  0x4e   : > { %p1071_p4 = pnand %p1069_p1, %p1055_p6  ;;  %p1077_p11 = scmp.lt.s32.totalorder %s1075_s13, %s1068_s15 }
  0x50   : > { %p1072_p0 = pneg %p1071_p4  ;;  %p1078_p13 = por %p1077_p11, %p1076_p5 }
  0x52   : > { %p1079_p2 = pnand %p1078_p13, %p1072_p0 }
  0x54   : > { %1082 = shalt.err (!%p1079_p2)
}
  0x55   : > { %s1193_s8 = smov 512   ;;  %s1194_s16 = smov 256  }
  0x56   : > { %s1195_s17 = smov 16   ;;  %s821_s23 = sshll.u32 %s1314_s11, 1 }
  0x57   : > { %929 = dma.hbm_to_vmem [thread:$0]  (!%p1336_p3), %s1345_s25, 4096, %s1347_s28, %s205_s26, %s1193_s8, %s1194_s16, %s1195_s17  }
  0x58   : > { %s852_s9 = sshll.u32 %s1187_s21, 5  ;;  %s229_s10 = scalar_lea.vmem [#allocation5], %s821_s23 }
  0x59   : > { %s1383_s13 = scalar_lea.hbm %s1722_s1, %s852_s9  ;;  %s237_s0 = sshll.u32 %s229_s10, 4  ;;  %s238_s0 = int_to_ptr.vmem [resolvable:$true] %s237_s0 }
  0x5a   : > { %s1748_s3 = sand.u32 1, %s1187_s21   ;;  %s1083_s20 = scalar_lea.hbm %s1383_s13, 32 }
  0x5b   : > { %s226_s27 = scalar_lea.sflag [#allocation6], %s1748_s3  ;;  %p1084_p12 = scmp.ne.s32.totalorder %s1383_s13, %s1083_s20 }
  0x5c   : > { %s1088_s28 = scalar_lea.hbm %s1722_s1, 64  ;;  %p1089_p9 = scmp.lt.u32.totalorder %s1383_s13, %s1722_s1 }
  0x5d   : > { %p1086_p7 = pnand %p1084_p12, %p1055_p6  ;;  %p1090_p10 = scmp.lt.u32.totalorder %s1088_s28, %s1083_s20 }
  0x5e   : > { %p1092_p4 = scmp.lt.u32.totalorder %s1083_s20, %s1383_s13 }
  0x5f   : > { %p1087_p8 = pneg %p1086_p7  ;;  %p1091_p1 = por %p1090_p10, %p1089_p9 }
  0x61   : > { %p1093_p0 = por %p1092_p4, %p1091_p1 }
  0x63   : > { %p1094_p5 = pnand %p1093_p0, %p1087_p8 }
  0x65   : > { %1097 = shalt.err (!%p1094_p5)
}
  0x66   : > { %s1098_s3 = scalar_lea.vmem %s238_s0, 32  ;;  %s1196_s10 = smov [#allocation5]  }
  0x67   : > { %p1099_p11 = scmp.ne.s32.totalorder %s238_s0, %s1098_s3  ;;  %s1103_s16 = sshll.u32 %s1196_s10, 4  ;;  %s1104_s16 = int_to_ptr.vmem [resolvable:$false] %s1103_s16 }
  0x68   : > { %s1105_s17 = scalar_lea.vmem %s1104_s16, 64  ;;  %p1106_p12 = scmp.lt.s32.totalorder %s238_s0, %s1104_s16 }
  0x69   : > { %p1101_p13 = pnand %p1099_p11, %p1055_p6  ;;  %p1107_p7 = scmp.lt.s32.totalorder %s1105_s17, %s1098_s3 }
  0x6b   : > { %p1102_p2 = pneg %p1101_p13  ;;  %p1108_p9 = por %p1107_p7, %p1106_p12 }
  0x6d   : > { %p1109_p10 = pnand %p1108_p9, %p1102_p2 }
  0x6f   : > { %1112 = shalt.err (!%p1109_p10)
}
  0x70   : > { %932 = dma.hbm_to_vmem [thread:$0]  (!%p1336_p3), %s1383_s13, 32, %s238_s0, %s226_s27  }
  0x71   : > { %p1749_p8 = scmp.ne.s32.totalorder %s1741_s7, 0 }
  0x72   : > { %s1409_s20 = sand.u32 (!%p1749_p8), 1, %s1179_s19   ;;  %p1750_p6 = scmp.ne.s32.totalorder (!%p1749_p8), %s1738_s29, 0 }
  0x73   : > { %254 = sbr.rel (%p1749_p8) target bundleno = 758 (0x2f6), region = 40  ;;  %s825_s23 = sshll.u32 (!%p1749_p8), %s1409_s20, 8 }
  0x74   : > { %s257_s9 = scalar_lea.sflag (!%p1749_p8), [#allocation3], %s1409_s20  ;;  %s1413_s15 = scalar_lea.vmem (!%p1749_p8), [#allocation2], %s825_s23 }
  0x7a   : > { %1158 = dma.done.wait (%p1750_p6), %s257_s9, 4096  }
  0x7b   : > { %1160 = vsyncadd (%p1750_p6), %s257_s9, 4294963200  ;;  %s265_s0 = sand.u32 1, %s1260_s22   ;;  %s826_s27 = sshll.u32 %s1409_s20, 1 }
  0x7c   : > { %s266_s7 = scalar_lea.sflag [#allocation6], %s265_s0  ;;  %s1421_s14 = scalar_lea.vmem [#allocation5], %s826_s27 }
  0x7d   : > { %1162 = dma.done.wait (%p1750_p6), %s266_s7, 32  }
  0x7e   : > { %1164 = vsyncadd (%p1750_p6), %s266_s7, 4294967264  ;;  %p1751_p3 = scmp.eq.s32.totalorder %s1260_s22, 0 }
  0x80   : > { %1166 = dma.done.wait (%p1751_p3), [#allocation6], 384   ;;  %p1752_p1 = pmov %p1751_p3 }
  0x81   : > { %v1197_v0 = vmov 0.0   ;;  %v320_v1 = vld [vmem:[%s1413_s15 + $0x8] sm:$0xff]  ;;  %v322_v2 = vld [vmem:[%s1413_s15 + $0x18] sm:$0xff]  ;;  %v319_v3 = vld [vmem:[%s1413_s15] sm:$0xff]  ;;  %s1198_s29 = smov 15   ;;  %s1199_s12 = smov 17   ;;  %v442_v59 = vlaneseq }
  0x82   : > { %1168 = vsyncadd (%p1752_p1), [#allocation6], 4294966912  ;;  %415 = vmatprep.mubr.f32.mxu1 %v1197_v0  ;;  %673 = vmatprep.mubr.f32.mxu0 %v1197_v0  ;;  %v854_v4 = vpack.c.bf16 %v322_v2, %v320_v1  ;;  %v321_v5 = vld [vmem:[%s1413_s15 + $0x10] sm:$0xff]  ;;  %v324_v6 = vld [vmem:[%s1413_s15 + $0x28] sm:$0xff]  ;;  %s1200_s13 = smov 1   ;;  %s1201_s11 = smov 16  }
  0x83   : > { %v326_v7 = vld [vmem:[%s1413_s15 + $0x38] sm:$0xff]  ;;  %v856_v8 = vpack.c.bf16 %v321_v5, %v319_v3  ;;  %v323_v10 = vld [vmem:[%s1413_s15 + $0x20] sm:$0xff]  ;;  %v325_v11 = vld [vmem:[%s1413_s15 + $0x30] sm:$0xff]  ;;  %s1202_s25 = smov 113   ;;  %s1203_s28 = smov 127   ;;  %v452_v60 = vshrl.u32 %v442_v59, 7 }
  0x84   : > { %v858_v9 = vpack.c.bf16 %v326_v7, %v324_v6  ;;  %v328_v12 = vld [vmem:[%s1413_s15 + $0x48] sm:$0xff]  ;;  %855 = vmatprep.subr.bf16.mxu1 %v854_v4  ;;  %v330_v13 = vld [vmem:[%s1413_s15 + $0x58] sm:$0xff]  ;;  %v860_v14 = vpack.c.bf16 %v325_v11, %v323_v10  ;;  %v327_v16 = vld [vmem:[%s1413_s15 + $0x40] sm:$0xff]  ;;  %s1204_s26 = smov 111   ;;  %s1205_s8 = smov 112   ;;  %v1206_v62 = vmov 0  }
  0x85   : > { %857 = vmatpush1.bf16.msra.mxu1 %v856_v8  ;;  %v862_v15 = vpack.c.bf16 %v330_v13, %v328_v12  ;;  %v329_v17 = vld [vmem:[%s1413_s15 + $0x50] sm:$0xff]  ;;  %v332_v18 = vld [vmem:[%s1413_s15 + $0x68] sm:$0xff]  ;;  %v334_v19 = vld [vmem:[%s1413_s15 + $0x78] sm:$0xff]  ;;  %s829_s3 = sshll.u32 %s1260_s22, 1  ;;  %v1489_v61 = vsub.s32 1, %v452_v60  ;;  %v1495_v1 = vsub.s32 0, %v452_v60 }
  0x86   : > { %859 = vmatprep.subr.bf16.mxu1 %v858_v9  ;;  %v864_v20 = vpack.c.bf16 %v329_v17, %v327_v16  ;;  %v866_v21 = vpack.c.bf16 %v334_v19, %v332_v18  ;;  %v331_v22 = vld [vmem:[%s1413_s15 + $0x60] sm:$0xff]  ;;  %v333_v23 = vld [vmem:[%s1413_s15 + $0x70] sm:$0xff]  ;;  %v336_v24 = vld [vmem:[%s1413_s15 + $0x88] sm:$0xff]  ;;  %p312_p4 = scmp.lt.s32.totalorder %s829_s3, 3  ;;  %v1497_v2 = vand.u32 127, %v442_v59  ;;  %s853_s0 = sshll.u32 %s1260_s22, 8 }
  0x87   : > { %v338_v25 = vld [vmem:[%s1413_s15 + $0x98] sm:$0xff]  ;;  %v868_v26 = vpack.c.bf16 %v333_v23, %v331_v22  ;;  %v335_v28 = vld [vmem:[%s1413_s15 + $0x80] sm:$0xff]  ;;  %v337_v29 = vld [vmem:[%s1413_s15 + $0x90] sm:$0xff]  ;;  %p1786_p5 = scmp.ne.s32.totalorder %s1739_s30, 0  ;;  %s1208_s22 = smov [#allocation8]  }
  0x88   : > { %v870_v27 = vpack.c.bf16 %v338_v25, %v336_v24  ;;  %v340_v30 = vld [vmem:[%s1413_s15 + $0xa8] sm:$0xff]  ;;  %v342_v31 = vld [vmem:[%s1413_s15 + $0xb8] sm:$0xff]  ;;  %v872_v32 = vpack.c.bf16 %v337_v29, %v335_v28  ;;  %v339_v34 = vld [vmem:[%s1413_s15 + $0xa0] sm:$0xff]  ;;  %s1795_s3 = smov (!%p312_p4, %s829_s3), 3  ;;  %vm487_vm6 = vcmp.lt.s32.totalorder %v1497_v2, 15  ;;  %vm509_vm7 = vcmp.lt.s32.totalorder %v1497_v2, 1 }
  0x89   : > { %861 = vmatpush1.bf16.msra.mxu1 %v860_v14  ;;  %v874_v33 = vpack.c.bf16 %v342_v31, %v340_v30  ;;  %v341_v35 = vld [vmem:[%s1413_s15 + $0xb0] sm:$0xff]  ;;  %v344_v36 = vld [vmem:[%s1413_s15 + $0xc8] sm:$0xff]  ;;  %v346_v37 = vld [vmem:[%s1413_s15 + $0xd8] sm:$0xff]  ;;  %s314_s17 = scalar_lea.vmem %s1723_s2, %s1795_s3  ;;  %vm444_vm8 = vcmp.lt.s32.totalorder %v1497_v2, 17  ;;  %vm529_vm9 = vcmp.lt.s32.totalorder %v1497_v2, 127  ;;  %vm467_vm11 = vcmp.lt.s32.totalorder %v1497_v2, 16 }
  0x8a   : > { %863 = vmatprep.subr.bf16.mxu1 %v862_v15  ;;  %v876_v38 = vpack.c.bf16 %v341_v35, %v339_v34  ;;  %v878_v39 = vpack.c.bf16 %v346_v37, %v344_v36  ;;  %v343_v40 = vld [vmem:[%s1413_s15 + $0xc0] sm:$0xff]  ;;  %v345_v41 = vld [vmem:[%s1413_s15 + $0xd0] sm:$0xff]  ;;  %v348_v42 = vld [vmem:[%s1413_s15 + $0xe8] sm:$0xff] }
  0x8b   : > { %v350_v43 = vld [vmem:[%s1413_s15 + $0xf8] sm:$0xff]  ;;  %v880_v44 = vpack.c.bf16 %v345_v41, %v343_v40  ;;  %v347_v46 = vld [vmem:[%s1413_s15 + $0xe0] sm:$0xff]  ;;  %v349_v47 = vld [vmem:[%s1413_s15 + $0xf0] sm:$0xff]  ;;  %s828_s15 = sshll.u32 %s1409_s20, 4 }
  0x8c   : > { %v882_v45 = vpack.c.bf16 %v350_v43, %v348_v42  ;;  %v884_v48 = vpack.c.bf16 %v349_v47, %v347_v46  ;;  %v316_v49 = vld [vmem:[#allocation7] sm:$0xff]  ;;  %v317_v55 = vld [vmem:[#allocation7 + $0x8] sm:$0xff]  ;;  %v318_v56 = vld [vmem:[#allocation7 + $0x10] sm:$0xff]  ;;  %s308_s27 = scalar_lea.vmem [#allocation8], %s828_s15 }
  0x8d   : > { %865 = vmatpush1.bf16.msra.mxu1 %v864_v20  ;;  %v1480_v57 = vld [vmem:[%s1421_s14] sm:$0x3]  ;;  %s703_s7 = sshll.u32 %s308_s27, 4  ;;  %s1679_s7 = int_to_ptr.vmem [resolvable:$true] %s703_s7 }
  0x8e   : > { %867 = vmatprep.subr.bf16.mxu1 %v866_v21  ;;  %v1482_v58 = vld [vmem:[%s314_s17] sm:$0x3]  ;;  %vm447_vm0 = vcmp.ge.s32.totalorder %v1480_v57, 1  ;;  %vm1732_vm2 = vcmp.lt.s32.totalorder %v1480_v57, 15 }
  0x8f   : > { %vm448_vm1 = vcmp.ge.s32.totalorder %v1482_v58, 1  ;;  %v512_v4 = vsel %vm447_vm0, 1, %v1206_v62  ;;  %vm552_vm5 = vcmp.lt.s32.totalorder %v1482_v58, 15  ;;  %v532_v23 = vsel %vm1732_vm2, 1, %v1206_v62 }
  0x90   : > { %vm449_vm3 = vmand %vm447_vm0, %vm448_vm1  ;;  %v520_v10 = vrot.slane %v512_v4, %v1489_v61  ;;  %v516_v22 = vrot.slane %v512_v4, %v1495_v1  ;;  %v540_v35 = vrot.slane %v532_v23, %v1489_v61  ;;  %v536_v36 = vrot.slane %v532_v23, %v1495_v1 }
  0x91   : > { %869 = vmatpush1.bf16.msra.mxu1 %v868_v26  ;;  %vm491_vm4 = vmand %vm1732_vm2, %vm448_vm1  ;;  %v450_v63 = vsel %vm449_vm3, 1, %v1206_v62  ;;  %v574_v37 = vsel %vm552_vm5, 1, %v1206_v62 }
  0x92   : > { %871 = vmatprep.subr.bf16.mxu1 %v870_v27  ;;  %v492_v3 = vsel %vm491_vm4, 1, %v1206_v62  ;;  %v458_v5 = vrot.slane %v450_v63, %v1489_v61  ;;  %v454_v7 = vrot.slane %v450_v63, %v1495_v1  ;;  %vm553_vm13 = vmand %vm447_vm0, %vm552_vm5  ;;  %vm1540_vm3 = vcmp.eq.s32.totalorder %v520_v10, 1 }
  0x93   : > { %v500_v9 = vrot.slane %v492_v3, %v1489_v61  ;;  %v496_v13 = vrot.slane %v492_v3, %v1495_v1  ;;  %v554_v29 = vsel %vm553_vm13, 1, %v1206_v62  ;;  %vm1577_vm2 = vcmp.eq.s32.totalorder %v516_v22, 1 }
  0x94   : > { %vm1515_vm10 = vcmp.eq.s32.totalorder %v458_v5, 1  ;;  %vm1528_vm14 = vcmp.eq.s32.totalorder %v454_v7, 1  ;;  %v562_v46 = vrot.slane %v554_v29, %v1489_v61  ;;  %v558_v58 = vrot.slane %v554_v29, %v1495_v1 }
  0x95   : > { %873 = vmatpush1.bf16.msra.mxu1 %v872_v32  ;;  %vm1548_vm0 = vcmp.eq.s32.totalorder %v496_v13, 1 }
  0x96   : > { %875 = vmatprep.subr.bf16.mxu1 %v874_v33 }
  0x99   : > { %877 = vmatpush1.bf16.msra.mxu1 %v876_v38 }
  0x9a   : > { %879 = vmatprep.subr.bf16.mxu1 %v878_v39 }
  0x9d   : > { %881 = vmatpush1.bf16.msra.mxu1 %v880_v44 }
  0x9e   : > { %883 = vmatprep.subr.bf16.mxu1 %v882_v45 }
  0xa1   : > { %885 = vmatpush1.bf16.msra.mxu1 %v884_v48 }
  0xa4   : > { %416 = vmatmul.mubr.f32.vlgmr.msra.gmra.mrb[0].mxu1 %v316_v49 }
  0xa5   : > { %421 = vmatprep.mubr.f32.mxu1 %v1197_v0 }
  0xa8   : > { %422 = vmatmul.mubr.f32.gmra.mrb[2].mxu1 %v317_v55 }
  0xa9   : > { %427 = vmatprep.mubr.f32.mxu1 %v1197_v0  ;;  %v470_v0 = vsel %vm448_vm1, 1, %v1206_v62  ;;  %vm1536_vm1 = vcmp.eq.s32.totalorder %v500_v9, 1 }
  0xaa   : > { %v478_v6 = vrot.slane %v470_v0, %v1489_v61  ;;  %v474_v8 = vrot.slane %v470_v0, %v1495_v1 }
  0xac   : > { %428 = vmatmul.mubr.f32.gmra.mrb[4].mxu1 %v318_v56  ;;  %vm1520_vm12 = vcmp.eq.s32.totalorder %v478_v6, 1  ;;  %vm1532_vm15 = vcmp.eq.s32.totalorder %v474_v8, 1  ;;  %v582_v56 = vrot.slane %v574_v37, %v1489_v61 }
  0xad   : > { %vm887_vm13 = vmpackc.low %vm1520_vm12, %vm1515_vm10  ;;  %vm1773_vm10 = vcmp.lt.s32.totalorder %v1480_v57, 15  ;;  %v578_v57 = vrot.slane %v574_v37, %v1495_v1 }
  0xae   : > { %vm890_vm4 = vmpackc.low %vm1532_vm15, %vm1528_vm14  ;;  %vm1605_vm14 = vcmp.eq.s32.totalorder %v536_v36, 1  ;;  %vm1621_vm15 = vcmp.eq.s32.totalorder %v562_v46, 1 }
  0xaf   : > { %vm1613_vm12 = vmand %vm1773_vm10, %vm552_vm5  ;;  %vm1207_vm5 = vmmov 1  }
  0xb0   : > { %v595_v13 = vsel %vm1613_vm12, 1, %v1206_v62 }
  0xb1   : > { %v599_v21 = vrot.slane %v595_v13, %v1495_v1 }
 0x177   : > { %v417_v50 = vpop.f32.mrb[0].mxu1 }
 0x178   : > { %v1466_v51 = vmax.f32 %v417_v50, 0.0  ;;  %v419_v52 = vpop.f32.mrb[1].mxu1 }
 0x179   : > { %v1468_v53 = vmax.f32 %v419_v52, 0.0 }
 0x17b   : > { %v1000_v54 = vpack.i.bf16 %v1468_v53, %v1466_v51 }
 0x17d   : > { %1001 = vrot.lane.b32.xlu1 %v1000_v54, %s1198_s29  ;;  %991 = vrot.lane.b32.xlu0 %v1000_v54, %s1199_s12  ;;  %s1677_s12 = scalar_lea.hbm %s1726_s5, %s853_s0 }
 0x181   : > { %1006 = vrot.lane.b32.xlu1 %v1000_v54, %s1200_s13  ;;  %996 = vrot.lane.b32.xlu0 %v1000_v54, %s1201_s11  ;;  %s689_s13 = scalar_lea.sflag [#allocation4], %s1409_s20  ;;  %s1113_s11 = scalar_lea.vmem %s1679_s7, 256 }
 0x182   : > { %p1114_p0 = scmp.ne.s32.totalorder %s1679_s7, %s1113_s11 }
 0x184   : > { %p1115_p11 = pnand %p1114_p0, %p1786_p5 }
 0x185   : > { %1016 = vrot.lane.b32.xlu1 %v1000_v54, %s1202_s25  ;;  %1011 = vrot.lane.b32.xlu0 %v1000_v54, %s1203_s28  ;;  %s1117_s25 = sshll.u32 %s1208_s22, 4  ;;  %s1118_s25 = int_to_ptr.vmem [resolvable:$false] %s1117_s25 }
 0x186   : > { %p1116_p13 = pneg %p1115_p11  ;;  %s1119_s28 = scalar_lea.vmem %s1118_s25, 512 }
 0x187   : > { %p1120_p2 = scmp.lt.s32.totalorder %s1679_s7, %s1118_s25  ;;  %p1121_p12 = scmp.lt.s32.totalorder %s1119_s28, %s1113_s11 }
 0x189   : > { %587 = vrot.lane.b32.xlu1 %v1466_v51, %s1204_s26  ;;  %1021 = vrot.lane.b32.xlu0 %v1000_v54, %s1205_s8  ;;  %p1122_p7 = por %p1121_p12, %p1120_p2 }
 0x18b   : > { %p1123_p9 = pnand %p1122_p7, %p1116_p13 }
 0x18d   : > { %589 = vrot.lane.b32.xlu0 %v1468_v53, %s1204_s26 }
 0x1ef   : > { %v1002_v11 = vpop.permute.xlu1 %1001  ;;  %v992_v12 = vpop.permute.xlu0 %991 }
 0x1f0   : > { %v994_v16 = vunpack.i.h.bf16 %v992_v12  ;;  %v993_v17 = vunpack.i.l.bf16 %v992_v12  ;;  %v1004_v24 = vunpack.i.h.bf16 %v1002_v11  ;;  %v1003_v25 = vunpack.i.l.bf16 %v1002_v11 }
 0x1f2   : > { %v445_v34 = vsel %vm444_vm8, %v993_v17, %v994_v16  ;;  %v446_v40 = vsel %vm444_vm8, %v994_v16, %v993_v17  ;;  %v488_v47 = vsel %vm487_vm6, %v1003_v25, %v1004_v24  ;;  %vm893_vm8 = vmpackc.low %vm1540_vm3, %vm1536_vm1  ;;  %v489_v59 = vsel %vm487_vm6, %v1004_v24, %v1003_v25  ;;  %v423_v25 = vpop.f32.mrb[2].mxu1 }
 0x1f3   : > { %v1007_v26 = vpop.permute.xlu1 %1006  ;;  %v997_v27 = vpop.permute.xlu0 %996  ;;  %vm896_vm6 = vmpackc.low %vm1577_vm2, %vm1548_vm0  ;;  %vm1632_vm2 = vcmp.eq.s32.totalorder %v582_v56, 1  ;;  %vm1643_vm0 = vcmp.eq.s32.totalorder %v558_v58, 1  ;;  %v603_v17 = vrot.slane %v595_v13, %v1489_v61 }
 0x1f4   : > { %v1009_v30 = vunpack.i.h.bf16 %v1007_v26  ;;  %v1008_v31 = vunpack.i.l.bf16 %v1007_v26  ;;  %v999_v32 = vunpack.i.h.bf16 %v997_v27  ;;  %v998_v33 = vunpack.i.l.bf16 %v997_v27  ;;  %vm902_vm3 = vmpackc.low %vm1605_vm14, %vm1207_vm5  ;;  %v425_v26 = vpop.f32.mrb[3].mxu1 }
 0x1f5   : > { %vm605_vm10 = vcmp.eq.s32.totalorder %v603_v17, 1  ;;  %v429_v27 = vpop.f32.mrb[4].mxu1 }
 0x1f6   : > { %v510_v38 = vsel %vm509_vm7, %v1008_v31, %v1009_v30  ;;  %v468_v39 = vsel %vm467_vm11, %v998_v33, %v999_v32  ;;  %v469_v41 = vsel %vm467_vm11, %v999_v32, %v998_v33  ;;  %v511_v48 = vsel %vm509_vm7, %v1009_v30, %v1008_v31  ;;  %v431_v1 = vpop.f32.mrb[5].mxu1 }
 0x1f7   : > { %v1012_v42 = vpop.permute.xlu0 %1011  ;;  %v886_v43 = vpack.c.bf16 %v468_v39, %v445_v34  ;;  %v889_v44 = vpack.c.bf16 %v469_v41, %v446_v40  ;;  %v892_v52 = vpack.c.bf16 %v510_v38, %v488_v47  ;;  %v1017_v54 = vpop.permute.xlu1 %1016  ;;  %vm1595_vm11 = vcmp.eq.s32.totalorder %v540_v35, 1 }
 0x1f8   : > { %v1014_v49 = vunpack.i.h.bf16 %v1012_v42  ;;  %v1013_v50 = vunpack.i.l.bf16 %v1012_v42  ;;  %vm571_vm7 = vcmp.lt.s32.totalorder %v1497_v2, 112  ;;  %v895_v3 = vpack.c.bf16 %v511_v48, %v489_v59  ;;  %vm899_vm1 = vmpackc.low %vm1595_vm11, %vm1207_vm5 }
 0x1f9   : > { %888 = vmatprep.subr.msk.bf16.mxu0 %vm887_vm13, %v886_v43  ;;  %v1019_v6 = vunpack.i.h.bf16 %v1017_v54  ;;  %v1018_v7 = vunpack.i.l.bf16 %v1017_v54  ;;  %vm1654_vm13 = vcmp.eq.s32.totalorder %v578_v57, 1  ;;  %vm591_vm11 = vcmp.lt.s32.totalorder %v1497_v2, 111 }
 0x1fa   : > { %v531_v60 = vsel %vm529_vm9, %v1014_v49, %v1013_v50  ;;  %891 = vmatpush1.bf16.msk.msra.mxu0 %vm890_vm4, %v889_v44  ;;  %v530_v10 = vsel %vm529_vm9, %v1013_v50, %v1014_v49  ;;  %vm1782_vm9 = vcmp.lt.s32.totalorder %v1497_v2, 113  ;;  %vm905_vm4 = vmpackc.low %vm1632_vm2, %vm1621_vm15  ;;  %v608_v2 = vld [vmem:[%s1725_s4] sm:$0xff] }
 0x1fb   : > { %v1022_v4 = vpop.permute.xlu0 %1021  ;;  %894 = vmatprep.subr.msk.bf16.mxu0 %vm893_vm8, %v892_v52  ;;  %v898_v11 = vpack.c.bf16 %v531_v60, %v1468_v53  ;;  %v551_v53 = vsel %vm1782_vm9, %v1019_v6, %v1018_v7  ;;  %v901_v16 = vpack.c.bf16 %v530_v10, %v1466_v51  ;;  %vm1785_vm8 = vmmov %vm1782_vm9  ;;  %v588_v22 = vpop.permute.xlu1 %587 }
 0x1fc   : > { %v1024_v8 = vunpack.i.h.bf16 %v1022_v4  ;;  %v1023_v9 = vunpack.i.l.bf16 %v1022_v4  ;;  %v550_v20 = vsel %vm1785_vm8, %v1018_v7, %v1019_v6  ;;  %vm908_vm14 = vmpackc.low %vm1654_vm13, %vm1643_vm0 }
 0x1fe   : > { %v573_v14 = vsel %vm571_vm7, %v1024_v8, %v1023_v9  ;;  %897 = vmatpush1.bf16.msk.msra.mxu0 %vm896_vm6, %v895_v3  ;;  %v572_v18 = vsel %vm571_vm7, %v1023_v9, %v1024_v8  ;;  %vm604_vm7 = vcmp.eq.s32.totalorder %v599_v21, 1 }
 0x1ff   : > { %900 = vmatprep.subr.msk.bf16.mxu0 %vm899_vm1, %v898_v11  ;;  %v904_v19 = vpack.c.bf16 %v573_v14, %v551_v53  ;;  %v590_v51 = vpop.permute.xlu0 %589  ;;  %v907_v61 = vpack.c.bf16 %v572_v18, %v550_v20 }
 0x200   : > { %v593_v23 = vsel %vm591_vm11, %v590_v51, %v588_v22  ;;  %v592_v24 = vsel %vm591_vm11, %v588_v22, %v590_v51 }
 0x202   : > { %903 = vmatpush1.bf16.msk.msra.mxu0 %vm902_vm3, %v901_v16 }
 0x203   : > { %906 = vmatprep.subr.msk.bf16.mxu0 %vm905_vm4, %v904_v19 }
 0x206   : > { %909 = vmatpush1.bf16.msk.msra.mxu0 %vm908_vm14, %v907_v61 }
 0x207   : > { %844 = vmatprep.subr.msk.mxu0 %vm605_vm10, %v593_v23 }
 0x20a   : > { %845 = vmatpush1.msk.msra.mxu0 %vm604_vm7, %v592_v24 }
 0x20b   : > { %674 = vmatmul.mubr.f32.vlgmr.msra.gmra.mrb[0].mxu0 %v608_v2 }
 0x2de   : > { %v675_v28 = vpop.f32.mrb[0].mxu0 }
 0x2df   : > { %v676_v29 = vadd.f32 %v675_v28, %v429_v27  ;;  %v677_v30 = vpop.f32.mrb[1].mxu0 }
 0x2e0   : > { %v678_v31 = vadd.f32 %v677_v30, %v431_v1 }
 0x2e1   : > { %v680_v32 = vmax.f32 %v676_v29, 0.0 }
 0x2e2   : > { %v681_v33 = vmax.f32 %v678_v31, 0.0 }
 0x2e3   : > { %v682_v34 = vadd.f32 %v680_v32, %v423_v25 }
 0x2e4   : > { %v683_v35 = vadd.f32 %v681_v33, %v425_v26 }
 0x2e5   : > { %v684_v36 = vmax.f32 %v682_v34, 0.0 }
 0x2e6   : > { %v685_v37 = vmax.f32 %v683_v35, 0.0 }
 0x2e7   : > { %686 = vst [vmem:[%s308_s27] sm:$0xff] %v684_v36 }
 0x2e8   : > { %687 = vst [vmem:[%s308_s27 + $0x8] sm:$0xff] %v685_v37 }
 0x2e9   : > { %1126 = shalt.err (!%p1123_p9)
}
 0x2ea   : > { %s1127_s20 = scalar_lea.hbm %s1677_s12, 256  ;;  %s1131_s3 = scalar_lea.hbm %s1726_s5, 512 }
 0x2eb   : > { %p1128_p10 = scmp.ne.s32.totalorder %s1677_s12, %s1127_s20  ;;  %p1132_p3 = scmp.lt.u32.totalorder %s1677_s12, %s1726_s5 }
 0x2ec   : > { %p1133_p1 = scmp.lt.u32.totalorder %s1131_s3, %s1127_s20  ;;  %p1135_p0 = scmp.lt.u32.totalorder %s1127_s20, %s1677_s12 }
 0x2ed   : > { %p1129_p8 = pnand %p1128_p10, %p1786_p5 }
 0x2ee   : > { %p1134_p4 = por %p1133_p1, %p1132_p3 }
 0x2ef   : > { %p1130_p6 = pneg %p1129_p8 }
 0x2f0   : > { %p1136_p11 = por %p1135_p0, %p1134_p4 }
 0x2f2   : > { %p1137_p13 = pnand %p1136_p11, %p1130_p6 }
 0x2f4   : > { %1140 = shalt.err (!%p1137_p13)
}
 0x2f5   : > { %920 = dma.vmem_to_hbm [thread:$0]  (%p1786_p5), %s1679_s7, 256, %s1677_s12, %s689_s13  }
 0x2f6 PF: > { %s715_s17 = sand.u32 1, %s1175_s18   ;;  %p1787_p2 = scmp.ne.s32.totalorder %s1740_s6, 0 }
 0x2f7   : > { %p1788_p12 = scmp.ge.s32.totalorder %s1187_s21, 2  ;;  %s716_s23 = scalar_lea.sflag [#allocation4], %s715_s17 }
 0x2f9   : > { %p934_p7 = pnand %p1788_p12, %p1787_p2 }
 0x2fb   : > { %1170 = dma.done.wait (!%p934_p7), %s716_s23, 256  }
 0x2fc   : > { %1172 = vsyncadd (!%p934_p7), %s716_s23, 4294967040  ;;  %s1789_s9 = sld [smem:[#allocation13_spill]]  ;;  %s1790_s20 = sld [smem:[#allocation14_spill]] }
 0x2fd   : > { %p21_p9 = scmp.ge.s32.totalorder %s1264_s24, 4   ;;  %s1791_s18 = smov %s1179_s19 }
 0x2fe   : > { %s1793_s21 = smov %s1264_s24 }
 0x2ff   :  { %23 = sbr.rel (!%p21_p9) target bundleno = 10 (0xa), region = 105 }
 0x302   : > { %s1792_s19 = smov %s1789_s9 }
 0x306   :  { %721 = vsyncpa [#allocation3], 1 }
 0x307   :  { %723 = vsyncpa [#allocation3 + $0x1], 1 }
 0x308   :  { %724 = vsyncpa [#allocation6], 1 }
 0x309   :  { %726 = vsyncpa [#allocation6 + $0x1], 1 }
 0x30a   :  { %727 = vsyncpa [#allocation4], 1 }
 0x30b   :  { %729 = vsyncpa [#allocation4 + $0x1], 1 }

</bundles_post_ra>
